<compile_context>
chip_gen: v5e
topology: v5e:2x2
jax: 0.10.0
libtpu: 0.0.40
codegen_flags: <defaults>
</compile_context>

<pallas_src>
import jax
import jax.numpy as jnp
from jax import lax
from jax.experimental import pallas as pl
from jax.experimental.pallas import tpu as pltpu


def _flash_attn_kernel(xq_ref, xkv_ref, wq_ref, wkv_ref, o_ref,
                       q_sc, m_sc, l_sc, acc_sc):
    qi = pl.program_id(1)          # q-tile index
    ki = pl.program_id(2)          # kv-tile index (innermost, "arbitrary")
    nk = pl.num_programs(2)
    tq = xq_ref.shape[1]
    tk = xkv_ref.shape[1]
    H = wq_ref.shape[1]

    @pl.when(ki == 0)
    def _init():
        # Project this q tile once per (batch, q-tile); 1/sqrt(C) already folded into wq.
        q_sc[...] = lax.dot_general(
            xq_ref[0], wq_ref[...],
            (((1,), (0,)), ((), ())),
            preferred_element_type=jnp.float32)
        m_sc[...] = jnp.full_like(m_sc, -jnp.inf)
        l_sc[...] = jnp.zeros_like(l_sc)
        acc_sc[...] = jnp.zeros_like(acc_sc)

    # Causal skip: kv tiles strictly above the diagonal contribute nothing.
    @pl.when(ki <= qi)
    def _compute():
        # Fused K/V projection: one (tk, C) @ (C, 2H) MXU pass for this kv tile.
        kv = lax.dot_general(
            xkv_ref[0], wkv_ref[...],
            (((1,), (0,)), ((), ())),
            preferred_element_type=jnp.float32)
        k = kv[:, :H]
        v = kv[:, H:]

        # Scores as a contraction over the head dim (no explicit k.T).
        s = lax.dot_general(
            q_sc[...], k,
            (((1,), (1,)), ((), ())),
            preferred_element_type=jnp.float32)                 # (tq, tk)

        # Causal mask in global coordinates; only bites on the diagonal tile.
        # Use a large finite negative instead of -inf to avoid NaN on any padded row.
        row = qi * tq + lax.broadcasted_iota(jnp.int32, (tq, tk), 0)
        col = ki * tk + lax.broadcasted_iota(jnp.int32, (tq, tk), 1)
        s = jnp.where(col <= row, s, jnp.float32(-1e30))

        # Online softmax update (f32 statistics).
        m_prev = m_sc[...]
        m_new = jnp.maximum(m_prev, jnp.max(s, axis=-1, keepdims=True))
        alpha = jnp.exp(m_prev - m_new)
        p = jnp.exp(s - m_new)
        l_sc[...] = alpha * l_sc[...] + jnp.sum(p, axis=-1, keepdims=True)
        acc_sc[...] = alpha * acc_sc[...] + lax.dot_general(
            p, v, (((1,), (0,)), ((), ())),
            preferred_element_type=jnp.float32)
        m_sc[...] = m_new

    # TODO(synk): nn.Dropout — identity in eval mode; a training path would draw a
    # Bernoulli mask on p via pltpu.prng_seed + pltpu.prng_random_bits and rescale by 1/(1-p).

    @pl.when(ki == nk - 1)
    def _finalize():
        inv_l = pl.reciprocal(l_sc[...], approx=True)           # EUP vrcp slot (~free)
        o_ref[0] = (acc_sc[...] * inv_l).astype(o_ref.dtype)


def attention_forward(x, wq, wk, wv, *, tile_q=128, tile_k=128):
    """x: (B, T, C); wq/wk/wv: (C, H). Returns (B, T, H)."""
    B, T, C = x.shape
    H = wq.shape[1]

    # Fold the 1/sqrt(C) scale into the Q weight (trace time, zero in-kernel cost),
    # and fuse K/V weights into a single (C, 2H) projection.
    scale = jnp.float32(C) ** jnp.float32(-0.5)
    wq_scaled = (wq.astype(jnp.float32) * scale).astype(wq.dtype)
    w_kv = jnp.concatenate([wk, wv], axis=1)

    tq = min(tile_q, T)
    tk = min(tile_k, T)
    assert T % tq == 0 and T % tk == 0, "T must be divisible by the tile sizes"
    nq = T // tq
    nk = T // tk

    return pl.pallas_call(
        _flash_attn_kernel,
        out_shape=jax.ShapeDtypeStruct((B, T, H), x.dtype),
        grid_spec=pltpu.PrefetchScalarGridSpec(
            num_scalar_prefetch=0,
            grid=(B, nq, nk),
            in_specs=[
                pl.BlockSpec((1, tq, C), lambda b, qi, ki: (b, qi, 0)),   # x for the q tile
                pl.BlockSpec((1, tk, C), lambda b, qi, ki: (b, ki, 0)),   # x for the kv tile
                pl.BlockSpec((C, H), lambda b, qi, ki: (0, 0)),           # wq (pre-scaled)
                pl.BlockSpec((C, 2 * H), lambda b, qi, ki: (0, 0)),       # fused [wk | wv]
            ],
            out_specs=pl.BlockSpec((1, tq, H), lambda b, qi, ki: (b, qi, 0)),
            scratch_shapes=[
                pltpu.VMEM((tq, H), jnp.float32),   # cached q tile
                pltpu.VMEM((tq, 1), jnp.float32),   # running max
                pltpu.VMEM((tq, 1), jnp.float32),   # running sum
                pltpu.VMEM((tq, H), jnp.float32),   # output accumulator
            ],
        ),
        compiler_params=pltpu.CompilerParams(
            dimension_semantics=("parallel", "parallel", "arbitrary"),
            vmem_limit_bytes=32 * 1024 * 1024,      # safe on v5e/v6e (128 MiB) and v7x (64 MiB)
        ),
    )(x, x, wq_scaled, w_kv)


def attention_reference(x, wq, wk, wv):
    """Plain-JAX reference mirroring the PyTorch forward (eval mode)."""
    B, T, C = x.shape
    q = x @ wq
    k = x @ wk
    v = x @ wv
    s = (q @ jnp.swapaxes(k, -1, -2)) * (C ** -0.5)
    mask = jnp.tril(jnp.ones((T, T), dtype=bool))
    s = jnp.where(mask, s, -jnp.inf)
    p = jax.nn.softmax(s, axis=-1)
    return p @ v


if __name__ == "__main__":
    # Small, deterministic shapes consistent with the module:
    #   embd_dim (C) = 32, head_dim (H) = 16, context/seq T = 8, batch B = 2
    B, T, C, H = 2, 8, 32, 16

    key = jax.random.PRNGKey(0)
    kx, kq, kk, kv = jax.random.split(key, 4)
    x = jax.random.normal(kx, (B, T, C), dtype=jnp.float32)

    # nn.Linear(embd_dim, head_dim, bias=False): weight ~ U(-1/sqrt(C), 1/sqrt(C)),
    # stored here already transposed to (C, H).
    bound = 1.0 / (C ** 0.5)
    wq = jax.random.uniform(kq, (C, H), jnp.float32, -bound, bound)
    wk = jax.random.uniform(kk, (C, H), jnp.float32, -bound, bound)
    wv = jax.random.uniform(kv, (C, H), jnp.float32, -bound, bound)

    out = attention_forward(x, wq, wk, wv)
    out = jax.block_until_ready(out)
    ref = attention_reference(x, wq, wk, wv)
    assert out.shape == (B, T, H)
    # approx=True reciprocal trades ~1e-4 relative error for an otherwise-idle EUP slot.
    assert jnp.allclose(out, ref, atol=2e-3, rtol=2e-3), "Pallas output mismatch vs reference"

    # Exercise the multi-tile flash path (q/kv tiling, causal tile skipping, off-diagonal tiles).
    T2 = 256
    x2 = jax.random.normal(jax.random.PRNGKey(1), (B, T2, C), dtype=jnp.float32)
    out2 = jax.block_until_ready(attention_forward(x2, wq, wk, wv, tile_q=128, tile_k=128))
    ref2 = attention_reference(x2, wq, wk, wv)
    assert jnp.allclose(out2, ref2, atol=2e-3, rtol=2e-3), "Pallas tiled output mismatch vs reference"

    print("KERNEL_OK")
</pallas_src>

<mosaic_0001>
module attributes {stable_mosaic.version = 11 : i64} {
  func.func @_flash_attn_kernel(%arg0: i32, %arg1: i32, %arg2: i32, %arg3: memref<1x8x32xf32, #tpu.memory_space<vmem>>, %arg4: memref<1x8x32xf32, #tpu.memory_space<vmem>>, %arg5: memref<32x16xf32, #tpu.memory_space<vmem>>, %arg6: memref<32x32xf32, #tpu.memory_space<vmem>>, %arg7: memref<1x8x16xf32, #tpu.memory_space<vmem>>, %arg8: memref<8x16xf32, #tpu.memory_space<vmem>>, %arg9: memref<8x1xf32, #tpu.memory_space<vmem>>, %arg10: memref<8x1xf32, #tpu.memory_space<vmem>>, %arg11: memref<8x16xf32, #tpu.memory_space<vmem>>) attributes {dimension_semantics = [#tpu.dimension_semantics<parallel>, #tpu.dimension_semantics<parallel>, #tpu.dimension_semantics<arbitrary>], iteration_bounds = array<i64: 2, 1, 1>, scalar_prefetch = 0 : i64, scratch_operands = 4 : i64, tpu.core_type = #tpu.core_type<tc>, window_params = [{transform_indices = @transform_0, window_bounds = array<i64: 1, 8, 32>}, {transform_indices = @transform_1, window_bounds = array<i64: 1, 8, 32>}, {pipeline_mode = #tpu.pipeline_mode<synchronous>, transform_indices = @transform_2, window_bounds = array<i64: 32, 16>}, {pipeline_mode = #tpu.pipeline_mode<synchronous>, transform_indices = @transform_3, window_bounds = array<i64: 32, 32>}, {transform_indices = @transform_4, window_bounds = array<i64: 1, 8, 16>}]} {
    %c0_i32 = arith.constant 0 : i32
    %0 = arith.cmpi eq, %arg2, %c0_i32 : i32
    %1 = arith.extui %0 : i1 to i32
    %c0_i32_0 = arith.constant 0 : i32
    %2 = arith.cmpi ne, %1, %c0_i32_0 : i32
    scf.if %2 {
      %c0 = arith.constant 0 : index
      %c0_4 = arith.constant 0 : index
      %c0_5 = arith.constant 0 : index
      %9 = vector.load %arg3[%c0, %c0_4, %c0_5] : memref<1x8x32xf32, #tpu.memory_space<vmem>>, vector<1x8x32xf32>
      %10 = vector.shape_cast %9 : vector<1x8x32xf32> to vector<8x32xf32>
      %c0_6 = arith.constant 0 : index
      %c0_7 = arith.constant 0 : index
      %11 = vector.load %arg5[%c0_6, %c0_7] : memref<32x16xf32, #tpu.memory_space<vmem>>, vector<32x16xf32>
      %cst = arith.constant dense<0.000000e+00> : vector<8x16xf32>
      %12 = tpu.matmul %10, %11, %cst {dimension_numbers = #tpu.dot_dimension_numbers<[1], [0], [0], [1], [0, 0, 1, 1], [], []>} : vector<8x32xf32>, vector<32x16xf32>, vector<8x16xf32> -> vector<8x16xf32>
      %c0_8 = arith.constant 0 : index
      %c0_9 = arith.constant 0 : index
      %13 = vector.load %arg8[%c0_8, %c0_9] : memref<8x16xf32, #tpu.memory_space<vmem>>, vector<8x16xf32>
      tpu.vector_store %arg8[%c0_8, %c0_9], %12 {strides = array<i32>} : memref<8x16xf32, #tpu.memory_space<vmem>>, vector<8x16xf32>,
      %cst_10 = arith.constant 0xFF800000 : f32
      %14 = vector.broadcast %cst_10 : f32 to vector<8x1xf32>
      %c0_11 = arith.constant 0 : index
      %c0_12 = arith.constant 0 : index
      %15 = vector.load %arg9[%c0_11, %c0_12] : memref<8x1xf32, #tpu.memory_space<vmem>>, vector<8x1xf32>
      tpu.vector_store %arg9[%c0_11, %c0_12], %14 {strides = array<i32>} : memref<8x1xf32, #tpu.memory_space<vmem>>, vector<8x1xf32>,
      %cst_13 = arith.constant 0.000000e+00 : f32
      %16 = vector.broadcast %cst_13 : f32 to vector<8x1xf32>
      %c0_14 = arith.constant 0 : index
      %c0_15 = arith.constant 0 : index
      %17 = vector.load %arg10[%c0_14, %c0_15] : memref<8x1xf32, #tpu.memory_space<vmem>>, vector<8x1xf32>
      tpu.vector_store %arg10[%c0_14, %c0_15], %16 {strides = array<i32>} : memref<8x1xf32, #tpu.memory_space<vmem>>, vector<8x1xf32>,
      %cst_16 = arith.constant 0.000000e+00 : f32
      %18 = vector.broadcast %cst_16 : f32 to vector<8x16xf32>
      %c0_17 = arith.constant 0 : index
      %c0_18 = arith.constant 0 : index
      %19 = vector.load %arg11[%c0_17, %c0_18] : memref<8x16xf32, #tpu.memory_space<vmem>>, vector<8x16xf32>
      tpu.vector_store %arg11[%c0_17, %c0_18], %18 {strides = array<i32>} : memref<8x16xf32, #tpu.memory_space<vmem>>, vector<8x16xf32>,
    } else {
    }
    %3 = arith.cmpi sle, %arg2, %arg1 : i32
    %4 = arith.extui %3 : i1 to i32
    %c0_i32_1 = arith.constant 0 : i32
    %5 = arith.cmpi ne, %4, %c0_i32_1 : i32
    scf.if %5 {
      %c0 = arith.constant 0 : index
      %c0_4 = arith.constant 0 : index
      %c0_5 = arith.constant 0 : index
      %9 = vector.load %arg4[%c0, %c0_4, %c0_5] : memref<1x8x32xf32, #tpu.memory_space<vmem>>, vector<1x8x32xf32>
      %10 = vector.shape_cast %9 : vector<1x8x32xf32> to vector<8x32xf32>
      %c0_6 = arith.constant 0 : index
      %c0_7 = arith.constant 0 : index
      %11 = vector.load %arg6[%c0_6, %c0_7] : memref<32x32xf32, #tpu.memory_space<vmem>>, vector<32x32xf32>
      %cst = arith.constant dense<0.000000e+00> : vector<8x32xf32>
      %12 = tpu.matmul %10, %11, %cst {dimension_numbers = #tpu.dot_dimension_numbers<[1], [0], [0], [1], [0, 0, 1, 1], [], []>} : vector<8x32xf32>, vector<32x32xf32>, vector<8x32xf32> -> vector<8x32xf32>
      %13 = vector.extract_strided_slice %12 {offsets = [0, 0], sizes = [8, 16], strides = [1, 1]} : vector<8x32xf32> to vector<8x16xf32>
      %14 = vector.extract_strided_slice %12 {offsets = [0, 16], sizes = [8, 16], strides = [1, 1]} : vector<8x32xf32> to vector<8x16xf32>
      %c0_8 = arith.constant 0 : index
      %c0_9 = arith.constant 0 : index
      %15 = vector.load %arg8[%c0_8, %c0_9] : memref<8x16xf32, #tpu.memory_space<vmem>>, vector<8x16xf32>
      %cst_10 = arith.constant dense<0.000000e+00> : vector<8x8xf32>
      %16 = tpu.matmul %15, %13, %cst_10 {dimension_numbers = #tpu.dot_dimension_numbers<[1], [1], [0], [0], [0, 0, 1, 0], [], []>} : vector<8x16xf32>, vector<8x16xf32>, vector<8x8xf32> -> vector<8x8xf32>
      %c8_i32 = arith.constant 8 : i32
      %17 = arith.muli %arg1, %c8_i32 : i32
      %18 = tpu.iota {dimensions = array<i32: 0>} : vector<8x8xi32>
      %19 = vector.broadcast %17 : i32 to vector<8x8xi32>
      %20 = arith.addi %19, %18 : vector<8x8xi32>
      %c8_i32_11 = arith.constant 8 : i32
      %21 = arith.muli %arg2, %c8_i32_11 : i32
      %22 = tpu.iota {dimensions = array<i32: 1>} : vector<8x8xi32>
      %23 = vector.broadcast %21 : i32 to vector<8x8xi32>
      %24 = arith.addi %23, %22 : vector<8x8xi32>
      %25 = arith.cmpi sle, %24, %20 : vector<8x8xi32>
      %cst_12 = arith.constant -1.000000e+30 : f32
      %26 = vector.broadcast %cst_12 : f32 to vector<8x8xf32>
      %27 = arith.select %25, %16, %26 : vector<8x8xi1>, vector<8x8xf32>
      %c0_13 = arith.constant 0 : index
      %c0_14 = arith.constant 0 : index
      %28 = vector.load %arg9[%c0_13, %c0_14] : memref<8x1xf32, #tpu.memory_space<vmem>>, vector<8x1xf32>
      %cst_15 = arith.constant dense<0xFF800000> : vector<8xf32>
      %29 = vector.multi_reduction <maximumf>, %27, %cst_15 [1] : vector<8x8xf32> to vector<8xf32>
      %30 = vector.shape_cast %29 : vector<8xf32> to vector<8x1xf32>
      %31 = arith.maximumf %28, %30 : vector<8x1xf32>
      %32 = arith.subf %28, %31 : vector<8x1xf32>
      %33 = math.exp %32 : vector<8x1xf32>
      %34 = vector.broadcast %31 : vector<8x1xf32> to vector<8x8xf32>
      %35 = arith.subf %27, %34 : vector<8x8xf32>
      %36 = math.exp %35 : vector<8x8xf32>
      %c0_16 = arith.constant 0 : index
      %c0_17 = arith.constant 0 : index
      %37 = vector.load %arg10[%c0_16, %c0_17] : memref<8x1xf32, #tpu.memory_space<vmem>>, vector<8x1xf32>
      %38 = arith.mulf %33, %37 : vector<8x1xf32>
      %cst_18 = arith.constant dense<0.000000e+00> : vector<8xf32>
      %39 = vector.multi_reduction <add>, %36, %cst_18 [1] : vector<8x8xf32> to vector<8xf32>
      %40 = vector.shape_cast %39 : vector<8xf32> to vector<8x1xf32>
      %41 = arith.addf %38, %40 : vector<8x1xf32>
      %c0_19 = arith.constant 0 : index
      %c0_20 = arith.constant 0 : index
      %42 = vector.load %arg10[%c0_19, %c0_20] : memref<8x1xf32, #tpu.memory_space<vmem>>, vector<8x1xf32>
      tpu.vector_store %arg10[%c0_19, %c0_20], %41 {strides = array<i32>} : memref<8x1xf32, #tpu.memory_space<vmem>>, vector<8x1xf32>,
      %c0_21 = arith.constant 0 : index
      %c0_22 = arith.constant 0 : index
      %43 = vector.load %arg11[%c0_21, %c0_22] : memref<8x16xf32, #tpu.memory_space<vmem>>, vector<8x16xf32>
      %44 = vector.broadcast %33 : vector<8x1xf32> to vector<8x16xf32>
      %45 = arith.mulf %44, %43 : vector<8x16xf32>
      %cst_23 = arith.constant dense<0.000000e+00> : vector<8x16xf32>
      %46 = tpu.matmul %36, %14, %cst_23 {dimension_numbers = #tpu.dot_dimension_numbers<[1], [0], [0], [1], [0, 0, 1, 1], [], []>} : vector<8x8xf32>, vector<8x16xf32>, vector<8x16xf32> -> vector<8x16xf32>
      %47 = arith.addf %45, %46 : vector<8x16xf32>
      %c0_24 = arith.constant 0 : index
      %c0_25 = arith.constant 0 : index
      %48 = vector.load %arg11[%c0_24, %c0_25] : memref<8x16xf32, #tpu.memory_space<vmem>>, vector<8x16xf32>
      tpu.vector_store %arg11[%c0_24, %c0_25], %47 {strides = array<i32>} : memref<8x16xf32, #tpu.memory_space<vmem>>, vector<8x16xf32>,
      %c0_26 = arith.constant 0 : index
      %c0_27 = arith.constant 0 : index
      %49 = vector.load %arg9[%c0_26, %c0_27] : memref<8x1xf32, #tpu.memory_space<vmem>>, vector<8x1xf32>
      tpu.vector_store %arg9[%c0_26, %c0_27], %31 {strides = array<i32>} : memref<8x1xf32, #tpu.memory_space<vmem>>, vector<8x1xf32>,
    } else {
    }
    %c0_i32_2 = arith.constant 0 : i32
    %6 = arith.cmpi eq, %arg2, %c0_i32_2 : i32
    %7 = arith.extui %6 : i1 to i32
    %c0_i32_3 = arith.constant 0 : i32
    %8 = arith.cmpi ne, %7, %c0_i32_3 : i32
    scf.if %8 {
      %c0 = arith.constant 0 : index
      %c0_4 = arith.constant 0 : index
      %9 = vector.load %arg10[%c0, %c0_4] : memref<8x1xf32, #tpu.memory_space<vmem>>, vector<8x1xf32>
      %10 = tpu.reciprocal %9 {approx = true} : vector<8x1xf32> -> vector<8x1xf32>
      %c0_5 = arith.constant 0 : index
      %c0_6 = arith.constant 0 : index
      %11 = vector.load %arg11[%c0_5, %c0_6] : memref<8x16xf32, #tpu.memory_space<vmem>>, vector<8x16xf32>
      %12 = vector.broadcast %10 : vector<8x1xf32> to vector<8x16xf32>
      %13 = arith.mulf %11, %12 : vector<8x16xf32>
      %c0_7 = arith.constant 0 : index
      %c0_8 = arith.constant 0 : index
      %c0_9 = arith.constant 0 : index
      %14 = vector.load %arg7[%c0_7, %c0_8, %c0_9] : memref<1x8x16xf32, #tpu.memory_space<vmem>>, vector<1x8x16xf32>
      %15 = vector.shape_cast %14 : vector<1x8x16xf32> to vector<8x16xf32>
      %16 = vector.shape_cast %13 : vector<8x16xf32> to vector<1x8x16xf32>
      tpu.vector_store %arg7[%c0_7, %c0_8, %c0_9], %16 {strides = array<i32>} : memref<1x8x16xf32, #tpu.memory_space<vmem>>, vector<1x8x16xf32>,
    } else {
    }
    return
  }
  func.func @transform_0(%arg0: i32, %arg1: i32, %arg2: i32) -> (i32, i32, i32) {
    %c0_i32 = arith.constant 0 : i32
    %c0_i32_0 = arith.constant 0 : i32
    return %arg0, %arg1, %c0_i32 : i32, i32, i32
  }
  func.func @transform_1(%arg0: i32, %arg1: i32, %arg2: i32) -> (i32, i32, i32) {
    %c0_i32 = arith.constant 0 : i32
    %c0_i32_0 = arith.constant 0 : i32
    return %arg0, %arg2, %c0_i32 : i32, i32, i32
  }
  func.func @transform_2(%arg0: i32, %arg1: i32, %arg2: i32) -> (i32, i32) {
    %c0_i32 = arith.constant 0 : i32
    %c0_i32_0 = arith.constant 0 : i32
    %c0_i32_1 = arith.constant 0 : i32
    return %c0_i32, %c0_i32_0 : i32, i32
  }
  func.func @transform_3(%arg0: i32, %arg1: i32, %arg2: i32) -> (i32, i32) {
    %c0_i32 = arith.constant 0 : i32
    %c0_i32_0 = arith.constant 0 : i32
    %c0_i32_1 = arith.constant 0 : i32
    return %c0_i32, %c0_i32_0 : i32, i32
  }
  func.func @transform_4(%arg0: i32, %arg1: i32, %arg2: i32) -> (i32, i32, i32) {
    %c0_i32 = arith.constant 0 : i32
    %c0_i32_0 = arith.constant 0 : i32
    return %arg0, %arg1, %c0_i32 : i32, i32, i32
  }
}

</mosaic_0001>

<bundles_post_ra>
// kernel: tpu_custom_call.1
= control target key start
LH: loop header
LB: loop body
LE: loop exit
PB: predicated region body
PF: predicated region fallthrough
CT: control target
= control target key end

     0   :  { %9 = vsyncpa [#allocation7], 0  ;;  %s971_s0 = inlined_call_operand.vmem [shape: f32[2,8,32], index: 0, kind: input, shape index: {}]   ;;  %s972_s1 = inlined_call_operand.hbm [shape: f32[2,8,32], index: 1, kind: input, shape index: {}]   ;;  %s973_s2 = inlined_call_operand.vmem [shape: f32[32,16], index: 2, kind: input, shape index: {}]   ;;  %s974_s3 = inlined_call_operand.vmem [shape: f32[32,32], index: 3, kind: input, shape index: {}]   ;;  %s975_s4 = inlined_call_operand.hbm [shape: f32[2,8,16], index: 4, kind: output, shape index: {}]  }
   0x1   :  { %11 = vsyncpa [#allocation7 + $0x1], 0 }
   0x2   :  { %12 = vsyncpa [#allocation8], 0 }
   0x3   :  { %14 = vsyncpa [#allocation8 + $0x1], 0  ;;  %s805_s15 = smov 0   ;;  %s807_s16 = smov 0  }
   0x4   :  { %s809_s17 = smov 0   ;;  %s811_s18 = smov 0  }
   0x5   :  { %s813_s19 = smov 0   ;;  %s815_s20 = smov 0  }
   0x6 LB: > { %s569_s21 = sadd.s32 4294967295, %s774_s20   ;;  %s570_s22 = sadd.s32 4294967294, %s774_s20   ;;  %s774_s20 = sphi %s815_s20, %s20_s20   ;;  %s770_s19 = sphi %s813_s19, %s984_s19   ;;  %s766_s18 = sphi %s811_s18, %s983_s18   ;;  %s762_s17 = sphi %s809_s17, %s982_s17   ;;  %s758_s16 = sphi %s807_s16, %s981_s16   ;;  %s754_s15 = sphi %s805_s15, %s980_s15  }
   0x7   : > { %s39_s23 = sadd.s32 1, %s770_s19  ;;  %s76_s24 = sadd.s32 1, %s762_s17 }
   0x8   : > { %p41_p0 = scmp.ge.s32.totalorder %s39_s23, 2  ;;  %p83_p1 = scmp.ne.s32.totalorder %s762_s17, %s758_s16 }
   0x9   : > { %p84_p2 = scmp.eq.s32.totalorder %s774_s20, 0  ;;  %p89_p3 = scmp.ne.s32.totalorder %s758_s16, %s754_s15 }
   0xa   : > { %s986_s23 = smov (%p41_p0, %s39_s23), 0  ;;  %p90_p5 = scmp.eq.s32.totalorder %s569_s21, 0 }
   0xb   : > { %p846_p4 = por %p84_p2, %p83_p1  ;;  %s71_s26 = ssub.s32 %s770_s19, %s986_s23 }
   0xc   : > { %p157_p6 = scmp.eq.s32.totalorder %s569_s21, 1  ;;  %p74_p7 = scmp.eq.s32.totalorder %s71_s26, 0 }
   0xd   : > { %p852_p8 = por %p90_p5, %p89_p3  ;;  %p163_p10 = scmp.eq.s32.totalorder %s570_s22, 1 }
   0xe   : > { %p856_p9 = por %p157_p6, %p83_p1  ;;  %p572_p12 = scmp.ge.s32.totalorder %s774_s20, 2 }
   0xf   : > { %s861_s29 = scalar_select %p74_p7, %s762_s17, %s76_s24  }
  0x10   : > { %p863_p11 = por %p163_p10, %p89_p3  ;;  %p600_p13 = scmp.lt.s32.totalorder %s774_s20, 2 }
  0x11   : > { %s199_s5 = sand.u32 1, %s762_s17   ;;  %s574_s7 = sshll.u32 %s770_s19, 3 }
  0x12   : > { %s573_s6 = sshll.u32 %s199_s5, 3  ;;  %s208_s10 = scalar_lea.hbm %s972_s1, %s574_s7 }
  0x13   : > { %s203_s11 = scalar_lea.vmem [#allocation6], %s573_s6  ;;  %s210_s13 = sshll.u32 %s208_s10, 4  ;;  %s211_s13 = int_to_ptr.hbm [resolvable:$true] %s210_s13 }
  0x14   : > { %s212_s12 = sshll.u32 %s203_s11, 4  ;;  %p593_p0 = pnand %p600_p13, %p846_p4  ;;  %s213_s12 = int_to_ptr.vmem [resolvable:$true] %s212_s12 }
  0x15   : > { %p575_p1 = scmp.ge.s32.totalorder %s774_s20, 1  ;;  %p217_p2 = scmp.lt.s32.totalorder %s774_s20, 3 }
  0x16   : > { %s200_s14 = scalar_lea.sflag [#allocation7], %s199_s5 }
  0x17   : > { %595 = dma.hbm_to_vmem [thread:$0]  (!%p593_p0), %s211_s13, 128, %s213_s12, %s200_s14  }
  0x18   : > { %p218_p3 = pnand %p575_p1, %p217_p2 }
  0x19   : > { %s879_s21 = sand.u32 (!%p218_p3), 1, %s758_s16  }
  0x1a   : > { %221 = sbr.rel (%p218_p3) target bundleno = 782 (0x30e), region = 36  ;;  %s576_s22 = sshll.u32 (!%p218_p3), %s879_s21, 3 }
  0x1b   : > { %s224_s24 = scalar_lea.sflag (!%p218_p3), [#allocation7], %s879_s21  ;;  %s227_s26 = scalar_lea.vmem (!%p218_p3), [#allocation6], %s576_s22 }
  0x1f   : > { %745 = dma.done.wait (%p852_p8), %s224_s24, 128  }
  0x20   : > { %747 = vsyncadd (%p852_p8), %s224_s24, 4294967168  ;;  %p260_p4 = scmp.lt.s32.totalorder %s766_s18, 1  ;;  %v275_v0 = vld [vmem:[%s973_s2 + $0x18] sm:$0xff]  ;;  %v274_v1 = vld [vmem:[%s973_s2 + $0x10] sm:$0xff]  ;;  %vm276_vm0 = vcmask 261120   ;;  %vm300_vm1 = vcmask 130048   ;;  %v368_v16 = vlaneseq }
  0x21   : > { %292 = vmatpush.msra.mxu0 %v275_v0  ;;  %v314_v2 = vld [vmem:[%s974_s3 + $0x18] sm:$0xff]  ;;  %v273_v3 = vld [vmem:[%s973_s2 + $0x8] sm:$0xff]  ;;  %v313_v4 = vld [vmem:[%s974_s3 + $0x10] sm:$0xff]  ;;  %v776_v10 = vmov 0.0   ;;  %vm302_vm2 = vcmask 7168   ;;  %v778_v14 = vmov -inf  }
  0x22   : > { %s261_s25 = scalar_select %p260_p4, %s766_s18, 1  ;;  %331 = vmatpush.msra.mxu1 %v314_v2  ;;  %v312_v5 = vld [vmem:[%s974_s3 + $0x8] sm:$0xff]  ;;  %v272_v6 = vld [vmem:[%s973_s2] sm:$0xff]  ;;  %305 = vst.msk [vmem:[#allocation5] sm:$0xff] %vm300_vm1, %v776_v10  ;;  %v369_v17 = vshrl.u32 %v368_v16, 7  ;;  %v374_v18 = vand.u32 127, %v368_v16 }
  0x23   : > { %293 = vmatpush.msra.mxu0 %v274_v1  ;;  %v311_v8 = vld [vmem:[%s974_s3] sm:$0xff]  ;;  %303 = vst.msk [vmem:[#allocation3] sm:$0xff] %vm302_vm2, %v778_v14  ;;  %vm380_vm4 = vcmask 64512   ;;  %v779_v22 = vmov 0   ;;  %s455_s7 = scalar_lea.sflag [#allocation8], %s879_s21 }
  0x24   : > { %s578_s5 = sshll.u32 %s261_s25, 3  ;;  %332 = vmatpush.msra.mxu1 %v313_v4  ;;  %v310_v9 = vld [vmem:[%s227_s26] sm:$0xff]  ;;  %304 = vst.msk [vmem:[#allocation4] sm:$0xff] %vm302_vm2, %v776_v10  ;;  %vm377_vm3 = vcmp.le.s32.totalorder %v374_v18, %v369_v17  ;;  %654 = vset.pattern.permute.xlu0 %v779_v22  ;;  %s585_s26 = sshll.u32 %s766_s18, 3 }
  0x25   : > { %s266_s24 = scalar_lea.vmem %s971_s0, %s578_s5  ;;  %294 = vmatpush.msra.mxu0 %v273_v3  ;;  %s777_s5 = smov 112   ;;  %655 = vset.pattern.permute.xlu2 %v779_v22 }
  0x26   : > { %v271_v7 = vld [vmem:[%s266_s24] sm:$0xff]  ;;  %333 = vmatpush.msra.mxu1 %v312_v5  ;;  %s466_s14 = scalar_lea.hbm %s975_s4, %s585_s26  ;;  %s259_s24 = scalar_lea.vmem [#allocation9], %s576_s22 }
  0x27   : > { %295 = vmatpush.msra.mxu0 %v272_v6  ;;  %s468_s25 = sshll.u32 %s259_s24, 4  ;;  %s470_s6 = sshll.u32 %s466_s14, 4  ;;  %s469_s25 = int_to_ptr.vmem [resolvable:$true] %s468_s25  ;;  %s471_s6 = int_to_ptr.hbm [resolvable:$true] %s470_s6 }
  0x28   : > { %579 = vmatmul.msk.f32.vlgmr.msra.gmra.mxu0 %vm276_vm0, %v271_v7  ;;  %334 = vmatpush.msra.mxu1 %v311_v8  ;;  %s706_s8 = sshra.s32 %s471_s6, 4  ;;  %s712_s22 = scalar_lea.hbm %s975_s4, 16  ;;  %s707_s8 = int_to_ptr.hbm [resolvable:$true] %s706_s8 }
  0x29   : > { %580 = vmatmul.msk.f32.vlgmr.msra.gmra.mxu1 %vm276_vm0, %v310_v9  ;;  %v404_v39 = vld [vmem:[#allocation5] sm:$0xff]  ;;  %s708_s18 = scalar_lea.hbm %s707_s8, 8  ;;  %p713_p8 = scmp.lt.s32.totalorder %s707_s8, %s975_s4 }
  0x2a   : > { %v379_v23 = vld [vmem:[#allocation3] sm:$0xff]  ;;  %p709_p5 = scmp.ne.s32.totalorder %s707_s8, %s708_s18  ;;  %p714_p10 = scmp.lt.s32.totalorder %s712_s22, %s708_s18 }
  0x2b   : > { %v396_v34 = vld [vmem:[#allocation4] sm:$0xff] }
  0x2c   : > { %p710_p6 = pnand %p709_p5, %p856_p9  ;;  %p715_p13 = por %p714_p10, %p713_p8 }
  0x2e   : > { %p711_p7 = pneg %p710_p6 }
  0x30   : > { %p716_p0 = pnand %p715_p13, %p711_p7 }
  0xa5   : > { %v297_v11 = vpop.f32.mrf.mxu0 }
  0xa6   : > { %301 = vst.msk [vmem:[#allocation2] sm:$0xff] %vm300_vm1, %v297_v11  ;;  %v336_v12 = vpop.f32.mrf.mxu1 }
  0xa7   : > { %411 = vrot.lane.b32.xlu1 %v336_v12, %s777_s5  ;;  %581 = vmatpush.xpose.msk.msra.mxu2 %vm300_vm1, %v336_v12 }
  0xad   : > { %v339_v13 = vld [vmem:[#allocation2] sm:$0xff] }
  0xae   : > { %582 = vmatmul.msk.f32.vlgmr.msra.gmra.mxu2 %vm300_vm1, %v339_v13 }
 0x119   : > { %v412_v15 = vpop.permute.xlu1 %411 }
 0x11a   : > { %432 = vmatpush.msra.mxu3 %v412_v15 }
 0x131   : > { %v364_v19 = vpop.f32.mrf.mxu2 }
 0x132   : > { %v378_v20 = vsel %vm377_vm3, %v364_v19, -1e+30 }
 0x133   : > { %v381_v21 = vsel %vm380_vm4, %v378_v20, -inf }
 0x134   : > { %382 = vmax.xlane.f32.xlu0 %v381_v21 }
 0x1a7   : > { %v383_v24 = vpop.xlane.xlu0 %382 }
 0x1a8   : > { %v384_v25 = vmax.f32 %v379_v23, %v383_v24 }
 0x1aa   : > { %v385_v26 = vsub.f32 %v379_v23, %v384_v25  ;;  %439 = vst.msk [vmem:[#allocation3] sm:$0xff] %vm302_vm2, %v384_v25  ;;  %390 = vperm.xlu0 %654, %v384_v25  }
 0x1ac   : > { %v386_v27 = vmul.f32 1.442695, %v385_v26 }
 0x1ae   : > { %656 = vpow2.f32 %v386_v27 }
 0x1b4   : > { %v657_v28 = vpop.eup %656 }
 0x1b5   : > { %407 = vperm.xlu2 %655, %v657_v28   ;;  %v397_v35 = vmul.f32 %v657_v28, %v396_v34 }
 0x20f   : > { %v408_v40 = vpop.permute.xlu2 %407 }
 0x210   : > { %v410_v41 = vmul.f32 %v408_v40, %v404_v39 }
 0x21c   : > { %v391_v29 = vpop.permute.xlu0 %390 }
 0x21d   : > { %v393_v30 = vsub.f32 %v378_v20, %v391_v29 }
 0x21f   : > { %v394_v31 = vmul.f32 1.442695, %v393_v30 }
 0x221   : > { %658 = vpow2.f32 %v394_v31 }
 0x227   : > { %v659_v32 = vpop.eup %658 }
 0x228   : > { %583 = vmatmul.msk.f32.vlgmr.msra.gmra.mxu3 %vm380_vm4, %v659_v32  ;;  %v398_v33 = vsel %vm380_vm4, %v659_v32, 0.0 }
 0x229   : > { %399 = vadd.xlane.f32.xlu1 %v398_v33 }
 0x29c   : > { %v400_v36 = vpop.xlane.xlu1 %399 }
 0x29d   : > { %v401_v37 = vadd.f32 %v400_v36, %v397_v35 }
 0x29f   : > { %403 = vst.msk [vmem:[#allocation4] sm:$0xff] %vm302_vm2, %v401_v37 }
 0x2a6   : > { %v443_v38 = vld [vmem:[#allocation4] sm:$0xff] }
 0x2a7   : > { %660 = vrcp.f32 %v443_v38 }
 0x2ab   : > { %v434_v42 = vpop.f32.mrf.mxu3 }
 0x2ac   : > { %v437_v43 = vadd.f32 %v434_v42, %v410_v41 }
 0x2ad   : > { %v661_v44 = vpop.eup %660 }
 0x2ae   : > { %438 = vst.msk [vmem:[#allocation5] sm:$0xff] %vm300_vm1, %v437_v43  ;;  %448 = vperm.xlu2 %655, %v661_v44  }
 0x2b5   : > { %v445_v45 = vld [vmem:[#allocation5] sm:$0xff] }
 0x308   : > { %v449_v46 = vpop.permute.xlu2 %448 }
 0x309   : > { %v451_v47 = vmul.f32 %v449_v46, %v445_v45 }
 0x30b   : > { %453 = vst.msk [vmem:[%s259_s24] sm:$0xff] %vm300_vm1, %v451_v47 }
 0x30c   : > { %719 = shalt.err (!%p716_p0)
}
 0x30d   : > { %590 = dma.vmem_to_hbm [thread:$0]  (%p856_p9), %s469_s25, 128, %s471_s6, %s455_s7  }
 0x30e PF: > { %s482_s21 = sand.u32 1, %s754_s15   ;;  %p597_p1 = pnand %p572_p12, %p863_p11 }
 0x30f   : > { %s483_s5 = scalar_lea.sflag [#allocation8], %s482_s21 }
 0x310   : > { %p598_p2 = pneg %p597_p1 }
 0x312   : > { %749 = dma.done.wait (%p598_p2), %s483_s5, 128  }
 0x313   : > { %751 = vsyncadd (%p598_p2), %s483_s5, 4294967168  ;;  %s20_s20 = sadd.s32 1, %s774_s20   ;;  %s980_s15 = smov %s758_s16 }
 0x314   : > { %p17_p3 = scmp.ge.s32.totalorder %s20_s20, 4   ;;  %s981_s16 = smov %s762_s17 }
 0x315   : > { %s982_s17 = smov %s861_s29  ;;  %s983_s18 = smov %s770_s19 }
 0x316   : > { %s984_s19 = smov %s986_s23  ;;  %19 = sbr.rel (!%p17_p3) target bundleno = 6 (0x6), region = 96 }
 0x31b   :  { %489 = vsyncpa [#allocation7], 1 }
 0x31c   :  { %491 = vsyncpa [#allocation7 + $0x1], 1 }
 0x31d   :  { %492 = vsyncpa [#allocation8], 1 }
 0x31e   :  { %494 = vsyncpa [#allocation8 + $0x1], 1 }

</bundles_post_ra>
